<compile_context>
chip_gen: v5e
topology: v5e:2x2
jax: 0.10.0
libtpu: 0.0.40
codegen_flags: <defaults>
</compile_context>

<pallas_src>
import jax
import jax.numpy as jnp
from jax.experimental import pallas as pl
from jax.experimental.pallas import tpu as pltpu

EPS = 1e-5                      # nn.InstanceNorm2d default (affine=False, biased var)
INV_SQRT2 = 0.7071067811865476  # for exact (erf) GELU, matching torch.nn.GELU()


def _tconv_in_gelu_kernel(x_ref, w_ref, b_ref, mix_ref, o_ref, sum_ref, ssq_ref):
    # x_ref  : (1, Cin, T)          input spatial tile (lane axis = spatial)
    # w_ref  : (4*Cout, Cin)        tap-major folded conv-transpose weights
    # b_ref  : (4*Cout, 1)          bias replicated per tap (f32)
    # mix_ref: (4*Cout, 4*Cout)     mix[r,r'] = 1/(4*HW) iff same output channel
    # o_ref  : (1, 4*Cout, T)       output tile (lane-dense)
    # sum_ref, ssq_ref : (4*Cout,1) f32 scratch accumulators (persist across grid)
    p = pl.program_id(1)   # phase: 0 = accumulate stats, 1 = normalize + GELU
    k = pl.program_id(2)   # spatial tile index

    # One fused MXU matmul for all 4 conv-transpose taps (+ bias, f32 accumulate).
    y = jnp.dot(w_ref[...], x_ref[0],
                preferred_element_type=jnp.float32) + b_ref[...]   # (4*Cout, T)

    @pl.when((p == 0) & (k == 0))
    def _init():
        sum_ref[...] = jnp.zeros_like(sum_ref)
        ssq_ref[...] = jnp.zeros_like(ssq_ref)

    @pl.when(p == 0)
    def _accumulate_stats():
        sum_ref[...] += jnp.sum(y, axis=1, keepdims=True)
        ssq_ref[...] += jnp.sum(y * y, axis=1, keepdims=True)

    @pl.when(p == 1)
    def _normalize_gelu():
        # Per-channel mean / E[x^2] (reduced over taps + full spatial extent),
        # already broadcast back to the tap-major rows by the constant mix matrix.
        mean_r = jnp.dot(mix_ref[...], sum_ref[...], preferred_element_type=jnp.float32)
        ex2_r = jnp.dot(mix_ref[...], ssq_ref[...], preferred_element_type=jnp.float32)
        var_r = ex2_r - mean_r * mean_r            # biased variance (InstanceNorm2d)
        istd_r = jax.lax.rsqrt(var_r + jnp.float32(EPS))
        yn = (y - mean_r) * istd_r
        out = 0.5 * yn * (1.0 + jax.lax.erf(yn * jnp.float32(INV_SQRT2)))
        o_ref[0] = out.astype(o_ref.dtype)


def _choose_tile(hw, max_tile=2048):
    """Largest multiple of 128 that divides HW (capped), else the full extent."""
    t = min(max_tile, (hw // 128) * 128)
    while t >= 128:
        if hw % t == 0:
            return t
        t -= 128
    return hw


def transpose_convolution_block(x_nchw, weight, bias, *,
                                compute_dtype=jnp.float32, tile_hw=None):
    """x_nchw: (N, Cin, H, W); weight: (Cin, Cout, 2, 2); bias: (Cout,)."""
    N, Cin, H, W = x_nchw.shape
    Cin_w, Cout, kh, kw = weight.shape
    assert Cin_w == Cin and (kh, kw) == (2, 2)
    HW = H * W
    T = tile_hw if tile_hw is not None else _choose_tile(HW)
    assert HW % T == 0
    K = HW // T
    R = 4 * Cout                                   # rows of the fused output

    # --- glue: re-layout (pure reshapes / tiny host-side constants) -------------
    x_flat = x_nchw.reshape(N, Cin, HW).astype(compute_dtype)          # (N, Cin, HW)
    # weight (Cin, Cout, 2, 2) -> tap-major rows: row = (2a+b)*Cout + co
    w_fold = jnp.transpose(weight, (2, 3, 1, 0)).reshape(R, Cin).astype(compute_dtype)
    b_rows = jnp.tile(bias.astype(jnp.float32), 4).reshape(R, 1)        # (4*Cout, 1)
    # channel-mixing matrix: averages stats over the 4 taps of each channel and
    # broadcasts them back to all tap-major rows (1/(4*HW) folded in).
    r_idx = jnp.arange(R)
    mix = jnp.where((r_idx[:, None] % Cout) == (r_idx[None, :] % Cout),
                    1.0 / (4.0 * HW), 0.0).astype(jnp.float32)          # (R, R)

    # --- VMEM budget & cost hints ------------------------------------------------
    itemsize = jnp.dtype(compute_dtype).itemsize
    x_blk = Cin * T * itemsize
    o_blk = R * T * 4
    fixed = R * Cin * itemsize + R * 4 + R * R * 4 + 2 * R * 4
    need = 2 * (x_blk + o_blk) + 2 * fixed + 12 * o_blk   # double-buffers + f32 temps
    vmem_limit = int(min(64 * 1024 * 1024, max(16 * 1024 * 1024, 2 * need)))

    cost = pl.CostEstimate(
        flops=2 * 2 * N * HW * Cin * R,            # matmul runs in both passes
        transcendentals=N * R * HW,                # erf in the GELU
        bytes_accessed=(2 * x_flat.size * itemsize + w_fold.size * itemsize
                        + b_rows.size * 4 + mix.size * 4 + N * R * HW * 4),
    )

    out_flat = pl.pallas_call(
        _tconv_in_gelu_kernel,
        out_shape=jax.ShapeDtypeStruct((N, R, HW), jnp.float32),
        grid_spec=pltpu.PrefetchScalarGridSpec(
            num_scalar_prefetch=0,
            grid=(N, 2, K),                        # (batch, phase, spatial tiles)
            in_specs=[
                pl.BlockSpec((1, Cin, T), lambda n, p, k: (n, 0, k)),
                pl.BlockSpec((R, Cin), lambda n, p, k: (0, 0)),
                pl.BlockSpec((R, 1), lambda n, p, k: (0, 0)),
                pl.BlockSpec((R, R), lambda n, p, k: (0, 0)),
            ],
            # phase 0 parks on block 0 (no useless writebacks); phase 1 writes tile k
            out_specs=pl.BlockSpec((1, R, T), lambda n, p, k: (n, 0, p * k)),
            scratch_shapes=[
                pltpu.VMEM((R, 1), jnp.float32),   # per-row sum accumulator
                pltpu.VMEM((R, 1), jnp.float32),   # per-row sum-of-squares accumulator
            ],
        ),
        compiler_params=pltpu.CompilerParams(
            dimension_semantics=("parallel", "arbitrary", "arbitrary"),
            vmem_limit_bytes=vmem_limit,
        ),
        cost_estimate=cost,
    )(x_flat, w_fold, b_rows, mix)

    # --- glue: pixel-shuffle (N, 4*Cout, HW) -> NCHW (N, Cout, 2H, 2W) -----------
    out = out_flat.reshape(N, 2, 2, Cout, H, W)    # (n, a, b, co, h, w)
    out = jnp.transpose(out, (0, 3, 4, 1, 5, 2))   # (n, co, h, a, w, b)
    return out.reshape(N, Cout, 2 * H, 2 * W)


def _reference(x, weight, bias):
    """Pure-JAX reference with identical semantics (for correctness check)."""
    N, Cin, H, W = x.shape
    Cout = weight.shape[1]
    y = jnp.einsum("nchw,cdab->ndhawb", x, weight)           # stride-2, k=2 scatter
    y = y.reshape(N, Cout, 2 * H, 2 * W) + bias[None, :, None, None]
    mean = jnp.mean(y, axis=(2, 3), keepdims=True)
    var = jnp.mean((y - mean) ** 2, axis=(2, 3), keepdims=True)
    yn = (y - mean) / jnp.sqrt(var + EPS)
    return 0.5 * yn * (1.0 + jax.lax.erf(yn / jnp.sqrt(2.0)))


if __name__ == "__main__":
    key = jax.random.PRNGKey(0)
    kx, kw, kb = jax.random.split(key, 3)

    N, Cin, Cout, H, W = 2, 8, 4, 16, 16
    x = jax.random.normal(kx, (N, Cin, H, W), dtype=jnp.float32)
    weight = 0.1 * jax.random.normal(kw, (Cin, Cout, 2, 2), dtype=jnp.float32)  # ConvTranspose2d weight
    bias = 0.1 * jax.random.normal(kb, (Cout,), dtype=jnp.float32)

    ref = _reference(x, weight, bias)

    # f32 path, single spatial tile
    out = jax.block_until_ready(transpose_convolution_block(x, weight, bias))
    assert out.shape == (N, Cout, 2 * H, 2 * W)
    assert jnp.allclose(out, ref, atol=2e-4, rtol=2e-4), "f32 kernel mismatch vs reference"

    # f32 path, forced multi-tile (exercises the two-pass cross-tile stats + revisit)
    out_tiled = jax.block_until_ready(
        transpose_convolution_block(x, weight, bias, tile_hw=128))
    assert jnp.allclose(out_tiled, ref, atol=2e-4, rtol=2e-4), "tiled kernel mismatch vs reference"

    # bf16 matmul inputs (halved HBM input traffic; norm/GELU stay f32)
    out_bf16 = jax.block_until_ready(
        transpose_convolution_block(x, weight, bias, compute_dtype=jnp.bfloat16))
    assert float(jnp.max(jnp.abs(out_bf16 - ref))) < 5e-2, "bf16 kernel mismatch vs reference"

    print("KERNEL_OK")
</pallas_src>

<mosaic_0001>
module attributes {stable_mosaic.version = 11 : i64} {
  func.func @_tconv_in_gelu_kernel(%arg0: i32, %arg1: i32, %arg2: i32, %arg3: memref<1x8x256xf32, #tpu.memory_space<vmem>>, %arg4: memref<16x8xf32, #tpu.memory_space<vmem>>, %arg5: memref<16x1xf32, #tpu.memory_space<vmem>>, %arg6: memref<16x16xf32, #tpu.memory_space<vmem>>, %arg7: memref<1x16x256xf32, #tpu.memory_space<vmem>>, %arg8: memref<16x1xf32, #tpu.memory_space<vmem>>, %arg9: memref<16x1xf32, #tpu.memory_space<vmem>>) attributes {dimension_semantics = [#tpu.dimension_semantics<parallel>, #tpu.dimension_semantics<arbitrary>, #tpu.dimension_semantics<arbitrary>], iteration_bounds = array<i64: 2, 2, 1>, scalar_prefetch = 0 : i64, scratch_operands = 2 : i64, tpu.core_type = #tpu.core_type<tc>, window_params = [{transform_indices = @transform_0, window_bounds = array<i64: 1, 8, 256>}, {pipeline_mode = #tpu.pipeline_mode<synchronous>, transform_indices = @transform_1, window_bounds = array<i64: 16, 8>}, {pipeline_mode = #tpu.pipeline_mode<synchronous>, transform_indices = @transform_2, window_bounds = array<i64: 16, 1>}, {pipeline_mode = #tpu.pipeline_mode<synchronous>, transform_indices = @transform_3, window_bounds = array<i64: 16, 16>}, {transform_indices = @transform_4, window_bounds = array<i64: 1, 16, 256>}]} {
    %c0 = arith.constant 0 : index
    %c0_0 = arith.constant 0 : index
    %0 = vector.load %arg4[%c0, %c0_0] : memref<16x8xf32, #tpu.memory_space<vmem>>, vector<16x8xf32>
    %c0_1 = arith.constant 0 : index
    %c0_2 = arith.constant 0 : index
    %c0_3 = arith.constant 0 : index
    %1 = vector.load %arg3[%c0_1, %c0_2, %c0_3] : memref<1x8x256xf32, #tpu.memory_space<vmem>>, vector<1x8x256xf32>
    %2 = vector.shape_cast %1 : vector<1x8x256xf32> to vector<8x256xf32>
    %cst = arith.constant dense<0.000000e+00> : vector<16x256xf32>
    %3 = tpu.matmul %0, %2, %cst {dimension_numbers = #tpu.dot_dimension_numbers<[1], [0], [0], [1], [0, 0, 1, 1], [], []>} : vector<16x8xf32>, vector<8x256xf32>, vector<16x256xf32> -> vector<16x256xf32>
    %c0_4 = arith.constant 0 : index
    %c0_5 = arith.constant 0 : index
    %4 = vector.load %arg5[%c0_4, %c0_5] : memref<16x1xf32, #tpu.memory_space<vmem>>, vector<16x1xf32>
    %5 = vector.broadcast %4 : vector<16x1xf32> to vector<16x256xf32>
    %6 = arith.addf %3, %5 : vector<16x256xf32>
    %c0_i32 = arith.constant 0 : i32
    %7 = arith.cmpi eq, %arg1, %c0_i32 : i32
    %c0_i32_6 = arith.constant 0 : i32
    %8 = arith.cmpi eq, %arg2, %c0_i32_6 : i32
    %9 = arith.andi %7, %8 : i1
    %10 = arith.extui %9 : i1 to i32
    %c0_i32_7 = arith.constant 0 : i32
    %11 = arith.cmpi ne, %10, %c0_i32_7 : i32
    scf.if %11 {
      %cst_11 = arith.constant 0.000000e+00 : f32
      %18 = vector.broadcast %cst_11 : f32 to vector<16x1xf32>
      %c0_12 = arith.constant 0 : index
      %c0_13 = arith.constant 0 : index
      %19 = vector.load %arg8[%c0_12, %c0_13] : memref<16x1xf32, #tpu.memory_space<vmem>>, vector<16x1xf32>
      tpu.vector_store %arg8[%c0_12, %c0_13], %18 {strides = array<i32>} : memref<16x1xf32, #tpu.memory_space<vmem>>, vector<16x1xf32>,
      %cst_14 = arith.constant 0.000000e+00 : f32
      %20 = vector.broadcast %cst_14 : f32 to vector<16x1xf32>
      %c0_15 = arith.constant 0 : index
      %c0_16 = arith.constant 0 : index
      %21 = vector.load %arg9[%c0_15, %c0_16] : memref<16x1xf32, #tpu.memory_space<vmem>>, vector<16x1xf32>
      tpu.vector_store %arg9[%c0_15, %c0_16], %20 {strides = array<i32>} : memref<16x1xf32, #tpu.memory_space<vmem>>, vector<16x1xf32>,
    } else {
    }
    %c0_i32_8 = arith.constant 0 : i32
    %12 = arith.cmpi eq, %arg1, %c0_i32_8 : i32
    %13 = arith.extui %12 : i1 to i32
    %c0_i32_9 = arith.constant 0 : i32
    %14 = arith.cmpi ne, %13, %c0_i32_9 : i32
    scf.if %14 {
      %c0_11 = arith.constant 0 : index
      %c0_12 = arith.constant 0 : index
      %18 = vector.load %arg8[%c0_11, %c0_12] : memref<16x1xf32, #tpu.memory_space<vmem>>, vector<16x1xf32>
      %cst_13 = arith.constant dense<0.000000e+00> : vector<16xf32>
      %19 = vector.multi_reduction <add>, %6, %cst_13 [1] : vector<16x256xf32> to vector<16xf32>
      %20 = vector.shape_cast %19 : vector<16xf32> to vector<16x1xf32>
      %21 = arith.addf %18, %20 : vector<16x1xf32>
      %c0_14 = arith.constant 0 : index
      %c0_15 = arith.constant 0 : index
      %22 = vector.load %arg8[%c0_14, %c0_15] : memref<16x1xf32, #tpu.memory_space<vmem>>, vector<16x1xf32>
      tpu.vector_store %arg8[%c0_14, %c0_15], %21 {strides = array<i32>} : memref<16x1xf32, #tpu.memory_space<vmem>>, vector<16x1xf32>,
      %c0_16 = arith.constant 0 : index
      %c0_17 = arith.constant 0 : index
      %23 = vector.load %arg9[%c0_16, %c0_17] : memref<16x1xf32, #tpu.memory_space<vmem>>, vector<16x1xf32>
      %24 = arith.mulf %6, %6 : vector<16x256xf32>
      %cst_18 = arith.constant dense<0.000000e+00> : vector<16xf32>
      %25 = vector.multi_reduction <add>, %24, %cst_18 [1] : vector<16x256xf32> to vector<16xf32>
      %26 = vector.shape_cast %25 : vector<16xf32> to vector<16x1xf32>
      %27 = arith.addf %23, %26 : vector<16x1xf32>
      %c0_19 = arith.constant 0 : index
      %c0_20 = arith.constant 0 : index
      %28 = vector.load %arg9[%c0_19, %c0_20] : memref<16x1xf32, #tpu.memory_space<vmem>>, vector<16x1xf32>
      tpu.vector_store %arg9[%c0_19, %c0_20], %27 {strides = array<i32>} : memref<16x1xf32, #tpu.memory_space<vmem>>, vector<16x1xf32>,
    } else {
    }
    %c1_i32 = arith.constant 1 : i32
    %15 = arith.cmpi eq, %arg1, %c1_i32 : i32
    %16 = arith.extui %15 : i1 to i32
    %c0_i32_10 = arith.constant 0 : i32
    %17 = arith.cmpi ne, %16, %c0_i32_10 : i32
    scf.if %17 {
      %c0_11 = arith.constant 0 : index
      %c0_12 = arith.constant 0 : index
      %18 = vector.load %arg6[%c0_11, %c0_12] : memref<16x16xf32, #tpu.memory_space<vmem>>, vector<16x16xf32>
      %c0_13 = arith.constant 0 : index
      %c0_14 = arith.constant 0 : index
      %19 = vector.load %arg8[%c0_13, %c0_14] : memref<16x1xf32, #tpu.memory_space<vmem>>, vector<16x1xf32>
      %cst_15 = arith.constant dense<0.000000e+00> : vector<16x1xf32>
      %20 = tpu.matmul %18, %19, %cst_15 {dimension_numbers = #tpu.dot_dimension_numbers<[1], [0], [0], [1], [0, 0, 1, 1], [], []>} : vector<16x16xf32>, vector<16x1xf32>, vector<16x1xf32> -> vector<16x1xf32>
      %c0_16 = arith.constant 0 : index
      %c0_17 = arith.constant 0 : index
      %21 = vector.load %arg6[%c0_16, %c0_17] : memref<16x16xf32, #tpu.memory_space<vmem>>, vector<16x16xf32>
      %c0_18 = arith.constant 0 : index
      %c0_19 = arith.constant 0 : index
      %22 = vector.load %arg9[%c0_18, %c0_19] : memref<16x1xf32, #tpu.memory_space<vmem>>, vector<16x1xf32>
      %cst_20 = arith.constant dense<0.000000e+00> : vector<16x1xf32>
      %23 = tpu.matmul %21, %22, %cst_20 {dimension_numbers = #tpu.dot_dimension_numbers<[1], [0], [0], [1], [0, 0, 1, 1], [], []>} : vector<16x16xf32>, vector<16x1xf32>, vector<16x1xf32> -> vector<16x1xf32>
      %24 = arith.mulf %20, %20 : vector<16x1xf32>
      %25 = arith.subf %23, %24 : vector<16x1xf32>
      %cst_21 = arith.constant 9.99999974E-6 : f32
      %26 = vector.broadcast %cst_21 : f32 to vector<16x1xf32>
      %27 = arith.addf %25, %26 : vector<16x1xf32>
      %28 = math.rsqrt %27 : vector<16x1xf32>
      %29 = vector.broadcast %20 : vector<16x1xf32> to vector<16x256xf32>
      %30 = arith.subf %6, %29 : vector<16x256xf32>
      %31 = vector.broadcast %28 : vector<16x1xf32> to vector<16x256xf32>
      %32 = arith.mulf %30, %31 : vector<16x256xf32>
      %cst_22 = arith.constant 5.000000e-01 : f32
      %33 = vector.broadcast %cst_22 : f32 to vector<16x256xf32>
      %34 = arith.mulf %33, %32 : vector<16x256xf32>
      %cst_23 = arith.constant 0.707106769 : f32
      %35 = vector.broadcast %cst_23 : f32 to vector<16x256xf32>
      %36 = arith.mulf %32, %35 : vector<16x256xf32>
      %37 = math.erf %36 : vector<16x256xf32>
      %cst_24 = arith.constant 1.000000e+00 : f32
      %38 = vector.broadcast %cst_24 : f32 to vector<16x256xf32>
      %39 = arith.addf %38, %37 : vector<16x256xf32>
      %40 = arith.mulf %34, %39 : vector<16x256xf32>
      %c0_25 = arith.constant 0 : index
      %c0_26 = arith.constant 0 : index
      %c0_27 = arith.constant 0 : index
      %41 = vector.load %arg7[%c0_25, %c0_26, %c0_27] : memref<1x16x256xf32, #tpu.memory_space<vmem>>, vector<1x16x256xf32>
      %42 = vector.shape_cast %41 : vector<1x16x256xf32> to vector<16x256xf32>
      %43 = vector.shape_cast %40 : vector<16x256xf32> to vector<1x16x256xf32>
      tpu.vector_store %arg7[%c0_25, %c0_26, %c0_27], %43 {strides = array<i32>} : memref<1x16x256xf32, #tpu.memory_space<vmem>>, vector<1x16x256xf32>,
    } else {
    }
    return
  }
  func.func @transform_0(%arg0: i32, %arg1: i32, %arg2: i32) -> (i32, i32, i32) {
    %c0_i32 = arith.constant 0 : i32
    %c0_i32_0 = arith.constant 0 : i32
    return %arg0, %c0_i32, %arg2 : i32, i32, i32
  }
  func.func @transform_1(%arg0: i32, %arg1: i32, %arg2: i32) -> (i32, i32) {
    %c0_i32 = arith.constant 0 : i32
    %c0_i32_0 = arith.constant 0 : i32
    %c0_i32_1 = arith.constant 0 : i32
    return %c0_i32, %c0_i32_0 : i32, i32
  }
  func.func @transform_2(%arg0: i32, %arg1: i32, %arg2: i32) -> (i32, i32) {
    %c0_i32 = arith.constant 0 : i32
    %c0_i32_0 = arith.constant 0 : i32
    %c0_i32_1 = arith.constant 0 : i32
    return %c0_i32, %c0_i32_0 : i32, i32
  }
  func.func @transform_3(%arg0: i32, %arg1: i32, %arg2: i32) -> (i32, i32) {
    %c0_i32 = arith.constant 0 : i32
    %c0_i32_0 = arith.constant 0 : i32
    %c0_i32_1 = arith.constant 0 : i32
    return %c0_i32, %c0_i32_0 : i32, i32
  }
  func.func @transform_4(%arg0: i32, %arg1: i32, %arg2: i32) -> (i32, i32, i32) {
    %0 = arith.muli %arg1, %arg2 : i32
    %c0_i32 = arith.constant 0 : i32
    %c0_i32_0 = arith.constant 0 : i32
    return %arg0, %c0_i32, %0 : i32, i32, i32
  }
}

</mosaic_0001>

<bundles_post_ra>
// kernel: tpu_custom_call.1
= control target key start
LH: loop header
LB: loop body
LE: loop exit
PB: predicated region body
PF: predicated region fallthrough
CT: control target
= control target key end

     0   :  { %9 = vsyncpa [#allocation5], 0  ;;  %s1348_s0 = inlined_call_operand.vmem [shape: f32[2,8,256], index: 0, kind: input, shape index: {}]   ;;  %s1349_s1 = inlined_call_operand.vmem [shape: f32[16,8], index: 1, kind: input, shape index: {}]   ;;  %s1350_s2 = inlined_call_operand.vmem [shape: f32[16,1], index: 2, kind: input, shape index: {}]   ;;  %s1351_s3 = inlined_call_operand.hbm [shape: f32[16,16], index: 3, kind: input, shape index: {}]   ;;  %s1352_s4 = inlined_call_operand.hbm [shape: f32[2,16,256], index: 4, kind: output, shape index: {}]  }
   0x1   :  { %10 = vsyncpa [#allocation6], 0 }
   0x2   :  { %12 = vsyncpa [#allocation6 + $0x1], 0  ;;  %s1085_s15 = smov 0   ;;  %s1087_s16 = smov 0  }
   0x3   :  { %s1089_s17 = smov 0   ;;  %s1091_s18 = smov 0  }
   0x4   :  { %s1093_s19 = smov 0   ;;  %s1095_s20 = smov 0  }
   0x5   :  { %s1097_s21 = smov 0   ;;  %s1099_s22 = smov 0  }
   0x6 LB: > { %s779_s23 = sadd.s32 4294967295, %s1050_s22   ;;  %s780_s24 = sadd.s32 4294967294, %s1050_s22   ;;  %s1050_s22 = sphi %s1099_s22, %s18_s22   ;;  %s1046_s21 = sphi %s1097_s21, %s1362_s21   ;;  %s1042_s20 = sphi %s1095_s20, %s1361_s20   ;;  %s1038_s19 = sphi %s1093_s19, %s1360_s19   ;;  %s1034_s18 = sphi %s1091_s18, %s1359_s18   ;;  %s1030_s17 = sphi %s1089_s17, %s1358_s17   ;;  %s1026_s16 = sphi %s1087_s16, %s1357_s16   ;;  %s1022_s15 = sphi %s1085_s15, %s1356_s15  }
   0x7   : > { %s33_s25 = sadd.s32 1, %s1042_s20  ;;  %s37_s26 = sadd.s32 1, %s1046_s21 }
   0x8   : > { %p35_p0 = scmp.ge.s32.totalorder %s33_s25, 2  ;;  %s139_s27 = sadd.s32 1, %s1030_s17 }
   0x9   : > { %p149_p1 = scmp.ne.s32.totalorder %s1030_s17, %s1026_s16  ;;  %p150_p2 = scmp.eq.s32.totalorder %s779_s23, 3 }
   0xa   : > { %s1364_s25 = smov (%p35_p0, %s33_s25), 0  ;;  %s1366_s26 = smov (!%p35_p0, %s37_s26), %s1046_s21 }
   0xb   : > { %p1135_p3 = por %p150_p2, %p149_p1  ;;  %p155_p4 = scmp.ne.s32.totalorder %s1026_s16, %s1022_s15 }
   0xc   : > { %p39_p5 = scmp.ge.s32.totalorder %s1366_s26, 2  ;;  %p156_p6 = scmp.eq.s32.totalorder %s780_s24, 3 }
   0xd   : > { %p781_p7 = scmp.ge.s32.totalorder %s1050_s22, 1  ;;  %p163_p8 = scmp.lt.s32.totalorder %s1050_s22, 5 }
   0xe   : > { %s1368_s26 = smov (%p39_p5, %s1366_s26), 0  ;;  %p1145_p9 = por %p156_p6, %p155_p4 }
   0xf   : > { %p1149_p10 = pnand %p781_p7, %p163_p8  ;;  %s134_s5 = ssub.s32 %s1046_s21, %s1368_s26 }
  0x10   : > { %p137_p11 = scmp.eq.s32.totalorder %s134_s5, 0  ;;  %p832_p13 = scmp.eq.s32.totalorder %s779_s23, 0 }
  0x11   : > { %p824_p12 = pneg %p1149_p10  ;;  %s180_s8 = sshll.u32 %s1351_s3, 4  ;;  %s181_s8 = int_to_ptr.hbm [resolvable:$true] %s180_s8 }
  0x12   : > { %s1161_s9 = scalar_select %p137_p11, %s1030_s17, %s139_s27  }
  0x13   : > { %s1052_s10 = smov [#allocation4]   ;;  %p825_p0 = pnand %p832_p13, %p824_p12 }
  0x14   : > { %s182_s11 = sshll.u32 %s1052_s10, 4  ;;  %s1053_s12 = smov 128   ;;  %s183_s11 = int_to_ptr.vmem [resolvable:$true] %s182_s11 }
  0x15   : > { %s1054_s13 = smov 8   ;;  %211 = sbr.rel (%p1149_p10) target bundleno = 666 (0x29a), region = 36 }
  0x16   : > { %827 = dma.hbm_to_vmem [thread:$0]  (!%p825_p0), %s181_s8, 256, %s183_s11, [#allocation5], %s1053_s12, %s1053_s12, %s1054_s13  }
  0x1a   : > { %1013 = dma.done.wait (%p832_p13), [#allocation5], 256  }
  0x1b   : > { %1015 = vsyncadd (%p832_p13), [#allocation5], 4294967040  ;;  %s239_s14 = sand.u32 1, %s1026_s16   ;;  %p243_p1 = scmp.lt.s32.totalorder %s1038_s19, 1  ;;  %v1055_v0 = vmov 0   ;;  %v254_v3 = vld [vmem:[%s1349_s1] sm:$0xff] }
  0x1c   : > { %s1169_s23 = sshll.u32 %s239_s14, 5  ;;  %907 = vset.pattern.permute.xlu0 %v1055_v0  ;;  %vm270_vm0 = vcmask 64512   ;;  %v255_v4 = vld [vmem:[%s1349_s1 + $0x8] sm:$0xff]  ;;  %v258_v5 = vld [vmem:[%s1350_s2] sm:$0xff]  ;;  %p323_p2 = scmp.eq.s32.totalorder %s1034_s18, 0 }
  0x1d   : > { %s244_s24 = scalar_select %p243_p1, %s1038_s19, 1  ;;  %262 = vperm.xlu0 %907, %v258_v5   ;;  %v259_v6 = vld [vmem:[%s1350_s2 + $0x8] sm:$0xff]  ;;  %vm329_vm1 = vcmask (%p323_p2), 7168   ;;  %v1056_v17 = vmov (%p323_p2), 0.0  }
  0x1e   : > { %s1197_s5 = scalar_lea.vmem [#allocation7], %s1169_s23  ;;  %330 = vst.msk [vmem:[#allocation2] sm:$0xff] (%p323_p2), %vm329_vm1, %v1056_v17 }
  0x1f   : > { %s809_s27 = sshll.u32 %s244_s24, 4  ;;  %331 = vst.msk [vmem:[#allocation2 + $0x8] sm:$0xff] (%p323_p2), %vm329_vm1, %v1056_v17 }
  0x20   : > { %s250_s30 = scalar_lea.vmem %s1348_s0, %s809_s27  ;;  %332 = vst.msk [vmem:[#allocation3] sm:$0xff] (%p323_p2), %vm329_vm1, %v1056_v17 }
  0x21   : > { %v256_v1 = vld [vmem:[%s250_s30] sm:$0xff]  ;;  %v257_v2 = vld [vmem:[%s250_s30 + $0x8] sm:$0xff]  ;;  %333 = vst.msk [vmem:[#allocation3 + $0x8] sm:$0xff] (%p323_p2), %vm329_vm1, %v1056_v17 }
  0x22   : > { %292 = vmatpush.msra.mxu0 %v256_v1  ;;  %812 = vmatpush.msra.mxu2 %v256_v1 }
  0x23   : > { %315 = vmatpush.msra.mxu1 %v257_v2  ;;  %813 = vmatpush.msra.mxu3 %v257_v2 }
  0x24   : > { %789 = vmatmul.msk.f32.vlgmr.msra.gmra.mxu0 %vm270_vm0, %v254_v3  ;;  %790 = vmatmul.msk.f32.vlgmr.msra.gmra.mxu2 %vm270_vm0, %v255_v4 }
  0x25   : > { %791 = vmatmul.msk.f32.vlgmr.msra.gmra.mxu1 %vm270_vm0, %v254_v3  ;;  %792 = vmatmul.msk.f32.vlgmr.msra.gmra.mxu3 %vm270_vm0, %v255_v4 }
  0x26   : > { %267 = vperm.xlu0 %907, %v259_v6  }
  0x8f   : > { %v263_v7 = vpop.permute.xlu0 %262 }
  0x98   : > { %v268_v12 = vpop.permute.xlu0 %267 }
  0xa1   : > { %v294_v8 = vpop.f32.mrf.mxu0 }
  0xa2   : > { %v1188_v9 = vadd.f32 %v294_v8, %v263_v7  ;;  %v317_v10 = vpop.f32.mrf.mxu1 }
  0xa3   : > { %v1190_v11 = vadd.f32 %v317_v10, %v263_v7 }
  0xa5   : > { %328 = sbr.rel (!%p323_p2) target bundleno = 170 (0xaa), region = 44 }
  0xa7   : > { %v297_v13 = vpop.f32.mrf.mxu2 }
  0xa8   : > { %v1192_v14 = vadd.f32 %v297_v13, %v268_v12  ;;  %v320_v15 = vpop.f32.mrf.mxu3 }
  0xa9   : > { %v1194_v16 = vadd.f32 %v320_v15, %v268_v12 }
  0xaa PF: > { %p794_p4 = scmp.ne.s32.totalorder %s1034_s18, 0 }
  0xac   : > { %336 = sbr.rel (%p794_p4) target bundleno = 308 (0x134), region = 48 }
  0xb1   : > { %v352_v18 = vmul.f32 %v1188_v9, %v1188_v9  ;;  %v353_v19 = vmul.f32 %v1190_v11, %v1190_v11  ;;  %v339_v20 = vadd.f32 %v1190_v11, %v1188_v9  ;;  %v354_v22 = vmul.f32 %v1192_v14, %v1192_v14  ;;  %v337_v26 = vld [vmem:[#allocation2] sm:$0xff]  ;;  %v350_v27 = vld [vmem:[#allocation3] sm:$0xff]  ;;  %v338_v32 = vld [vmem:[#allocation2 + $0x8] sm:$0xff] }
  0xb2   : > { %v355_v23 = vmul.f32 %v1194_v16, %v1194_v16  ;;  %v342_v24 = vadd.f32 %v1194_v16, %v1192_v14  ;;  %vm347_vm2 = vcmask 7168   ;;  %v351_v33 = vld [vmem:[#allocation3 + $0x8] sm:$0xff] }
  0xb3   : > { %v356_v21 = vadd.f32 %v353_v19, %v352_v18  ;;  %340 = vadd.xlane.f32.xlu0 %v339_v20 }
  0xb4   : > { %v359_v25 = vadd.f32 %v355_v23, %v354_v22 }
  0xb5   : > { %357 = vadd.xlane.f32.xlu1 %v356_v21 }
  0xbb   : > { %343 = vadd.xlane.f32.xlu0 %v342_v24 }
  0xbd   : > { %360 = vadd.xlane.f32.xlu1 %v359_v25 }
 0x126   : > { %v341_v28 = vpop.xlane.xlu0 %340 }
 0x127   : > { %v345_v29 = vadd.f32 %v341_v28, %v337_v26 }
 0x128   : > { %v358_v30 = vpop.xlane.xlu1 %357 }
 0x129   : > { %v362_v31 = vadd.f32 %v358_v30, %v350_v27  ;;  %348 = vst.msk [vmem:[#allocation2] sm:$0xff] %vm347_vm2, %v345_v29 }
 0x12b   : > { %364 = vst.msk [vmem:[#allocation3] sm:$0xff] %vm347_vm2, %v362_v31 }
 0x12e   : > { %v344_v34 = vpop.xlane.xlu0 %343 }
 0x12f   : > { %v346_v35 = vadd.f32 %v344_v34, %v338_v32 }
 0x130   : > { %v361_v36 = vpop.xlane.xlu1 %360 }
 0x131   : > { %v363_v37 = vadd.f32 %v361_v36, %v351_v33  ;;  %349 = vst.msk [vmem:[#allocation2 + $0x8] sm:$0xff] %vm347_vm2, %v346_v35 }
 0x133   : > { %365 = vst.msk [vmem:[#allocation3 + $0x8] sm:$0xff] %vm347_vm2, %v363_v37 }
 0x134 PF: > { %p795_p5 = scmp.ne.s32.totalorder %s1034_s18, 1 }
 0x136   : > { %369 = sbr.rel (%p795_p5) target bundleno = 650 (0x28a), region = 52 }
 0x13b   : > { %v373_v38 = vld [vmem:[#allocation2 + $0x8] sm:$0xff]  ;;  %v372_v39 = vld [vmem:[#allocation2] sm:$0xff]  ;;  %v405_v40 = vld [vmem:[#allocation3 + $0x8] sm:$0xff]  ;;  %vm374_vm3 = vcmask 130048   ;;  %v1057_v44 = vmov 0  }
 0x13c   : > { %395 = vmatpush.msra.mxu0 %v373_v38  ;;  %814 = vmatpush.msra.mxu2 %v373_v38  ;;  %v370_v41 = vld [vmem:[#allocation4] sm:$0xff]  ;;  %v371_v42 = vld [vmem:[#allocation4 + $0x8] sm:$0xff]  ;;  %v404_v43 = vld [vmem:[#allocation3] sm:$0xff] }
 0x13d   : > { %420 = vmatpush.msra.mxu1 %v405_v40  ;;  %816 = vmatpush.msra.mxu3 %v405_v40 }
 0x13e   : > { %396 = vmatpush.msra.mxu0 %v372_v39  ;;  %815 = vmatpush.msra.mxu2 %v372_v39 }
 0x13f   : > { %796 = vmatmul.msk.f32.vlgmr.msra.gmra.mxu0 %vm374_vm3, %v370_v41  ;;  %797 = vmatmul.msk.f32.vlgmr.msra.gmra.mxu2 %vm374_vm3, %v371_v42 }
 0x140   : > { %421 = vmatpush.msra.mxu1 %v404_v43  ;;  %817 = vmatpush.msra.mxu3 %v404_v43 }
 0x141   : > { %798 = vmatmul.msk.f32.vlgmr.msra.gmra.mxu1 %vm374_vm3, %v370_v41  ;;  %799 = vmatmul.msk.f32.vlgmr.msra.gmra.mxu3 %vm374_vm3, %v371_v42 }
 0x142   : > { %908 = vset.pattern.permute.xlu0 %v1057_v44  ;;  %909 = vset.pattern.permute.xlu1 %v1057_v44 }
 0x1bc   : > { %v398_v45 = vpop.f32.mrf.mxu0 }
 0x1bd   : > { %v429_v46 = vmul.f32 %v398_v45, %v398_v45  ;;  %457 = vperm.xlu0 %908, %v398_v45  }
 0x1be   : > { %v423_v47 = vpop.f32.mrf.mxu1 }
 0x1bf   : > { %v431_v48 = vsub.f32 %v423_v47, %v429_v46 }
 0x1c1   : > { %v433_v49 = vadd.f32 1e-05, %v431_v48 }
 0x1c2   : > { %v401_v50 = vpop.f32.mrf.mxu2 }
 0x1c3   : > { %910 = vrsqrt.f32 %v433_v49  ;;  %v430_v51 = vmul.f32 %v401_v50, %v401_v50  ;;  %vm441_vm5 = vweird.f32 %v433_v49 }
 0x1c4   : > { %v426_v52 = vpop.f32.mrf.mxu3 }
 0x1c5   : > { %v432_v53 = vsub.f32 %v426_v52, %v430_v51  ;;  %462 = vperm.xlu0 %908, %v401_v50  }
 0x1c7   : > { %v434_v54 = vadd.f32 1e-05, %v432_v53 }
 0x1c9   : > { %v911_v55 = vpop.eup %910  ;;  %912 = vrsqrt.f32 %v434_v54  ;;  %vm451_vm8 = vweird.f32 %v434_v54 }
 0x1ca   : > { %v436_v56 = vmul.f32 %v911_v55, %v433_v49  ;;  %vm442_vm4 = vweird.f32 %v911_v55 }
 0x1cb   : > { %vm443_vm6 = vmor %vm441_vm5, %vm442_vm4 }
 0x1cc   : > { %v437_v57 = vmul.f32 %v911_v55, %v436_v56 }
 0x1ce   : > { %v438_v58 = vmul.f32 0.5, %v437_v57 }
 0x1cf   : > { %v913_v59 = vpop.eup %912 }
 0x1d0   : > { %v446_v60 = vmul.f32 %v913_v59, %v434_v54  ;;  %v439_v61 = vsub.f32 1.5, %v438_v58  ;;  %vm452_vm7 = vweird.f32 %v913_v59 }
 0x1d1   : > { %vm453_vm9 = vmor %vm451_vm8, %vm452_vm7 }
 0x1d2   : > { %v447_v62 = vmul.f32 %v913_v59, %v446_v60  ;;  %v440_v63 = vmul.f32 %v911_v55, %v439_v61 }
 0x1d4   : > { %v448_v0 = vmul.f32 0.5, %v447_v62  ;;  %v444_v1 = vsel %vm443_vm6, %v911_v55, %v440_v63 }
 0x1d5   : > { %471 = vperm.xlu1 %909, %v444_v1  }
 0x1d6   : > { %v449_v2 = vsub.f32 1.5, %v448_v0 }
 0x1d8   : > { %v450_v3 = vmul.f32 %v913_v59, %v449_v2 }
 0x1da   : > { %v454_v4 = vsel %vm453_vm9, %v913_v59, %v450_v3 }
 0x1dd   : > { %476 = vperm.xlu1 %909, %v454_v4  }
 0x22f   : > { %v458_v5 = vpop.permute.xlu0 %457 }
 0x230   : > { %v465_v6 = vsub.f32 %v1188_v9, %v458_v5  ;;  %v466_v7 = vsub.f32 %v1190_v11, %v458_v5 }
 0x237   : > { %v463_v17 = vpop.permute.xlu0 %462 }
 0x238   : > { %v467_v11 = vsub.f32 %v1192_v14, %v463_v17  ;;  %v468_v21 = vsub.f32 %v1194_v16, %v463_v17 }
 0x247   : > { %v472_v8 = vpop.permute.xlu1 %471 }
 0x248   : > { %v1217_v10 = vmul.f32 %v472_v8, %v465_v6  ;;  %v1219_v12 = vmul.f32 %v472_v8, %v466_v7 }
 0x24a   : > { %v1222_v13 = vmul.f32 0.70710677, %v1217_v10  ;;  %v1225_v15 = vmul.f32 0.70710677, %v1219_v12 }
 0x24c   : > { %v491_v18 = vmul.f32 %v1222_v13, %v1222_v13  ;;  %v531_v9 = vmul.f32 %v1225_v15, %v1225_v15 }
 0x24e   : > { %v492_v19 = vmin.f32 %v491_v18, 16.0  ;;  %v1232_v20 = vmin.f32 %v531_v9, 16.0 }
 0x24f   : > { %v477_v22 = vpop.permute.xlu1 %476 }
 0x250   : > { %v493_v23 = vmul.f32 2.1237322e-06, %v492_v19  ;;  %v504_v24 = vmul.f32 3.8918573e-05, %v492_v19  ;;  %v533_v25 = vmul.f32 2.1237322e-06, %v1232_v20  ;;  %v1236_v26 = vmul.f32 %v477_v22, %v467_v11 }
 0x251   : > { %v544_v27 = vmul.f32 3.8918573e-05, %v1232_v20  ;;  %v1239_v28 = vmul.f32 %v477_v22, %v468_v21 }
 0x252   : > { %v494_v29 = vadd.f32 0.00028619796, %v493_v23  ;;  %v505_v30 = vadd.f32 0.001143296, %v504_v24  ;;  %v534_v31 = vadd.f32 0.00028619796, %v533_v25 }
 0x253   : > { %v545_v14 = vadd.f32 0.001143296, %v544_v27  ;;  %v1242_v32 = vmul.f32 0.70710677, %v1236_v26  ;;  %v1246_v35 = vmul.f32 0.70710677, %v1239_v28 }
 0x254   : > { %v495_v33 = vmul.f32 %v494_v29, %v492_v19  ;;  %v506_v16 = vmul.f32 %v505_v30, %v492_v19  ;;  %v535_v34 = vmul.f32 %v534_v31, %v1232_v20 }
 0x255   : > { %v546_v36 = vmul.f32 %v545_v14, %v1232_v20  ;;  %v571_v37 = vmul.f32 %v1242_v32, %v1242_v32  ;;  %v611_v41 = vmul.f32 %v1246_v35, %v1246_v35 }
 0x256   : > { %v496_v38 = vadd.f32 0.0036580483, %v495_v33  ;;  %v507_v39 = vadd.f32 0.014752088, %v506_v16  ;;  %v536_v40 = vadd.f32 0.0036580483, %v535_v34 }
 0x257   : > { %v547_v42 = vadd.f32 0.014752088, %v546_v36  ;;  %v1253_v43 = vmin.f32 %v571_v37, 16.0  ;;  %v1256_v47 = vmin.f32 %v611_v41, 16.0 }
 0x258   : > { %v497_v44 = vmul.f32 %v496_v38, %v492_v19  ;;  %v508_v45 = vmul.f32 %v507_v39, %v492_v19  ;;  %v537_v46 = vmul.f32 %v536_v40, %v1232_v20 }
 0x259   : > { %v548_v48 = vmul.f32 %v547_v42, %v1232_v20  ;;  %v573_v49 = vmul.f32 2.1237322e-06, %v1253_v43  ;;  %v584_v50 = vmul.f32 3.8918573e-05, %v1253_v43  ;;  %v613_v59 = vmul.f32 2.1237322e-06, %v1256_v47 }
 0x25a   : > { %v498_v51 = vadd.f32 0.05243302, %v497_v44  ;;  %v509_v52 = vadd.f32 0.112945676, %v508_v45  ;;  %v538_v58 = vadd.f32 0.05243302, %v537_v46 }
 0x25b   : > { %v549_v53 = vadd.f32 0.112945676, %v548_v48  ;;  %v574_v54 = vadd.f32 0.00028619796, %v573_v49  ;;  %v585_v55 = vadd.f32 0.001143296, %v584_v50 }
 0x25c   : > { %v499_v56 = vmul.f32 %v498_v51, %v492_v19  ;;  %v510_v57 = vmul.f32 %v509_v52, %v492_v19  ;;  %v624_v63 = vmul.f32 3.8918573e-05, %v1256_v47  ;;  %v539_v5 = vmul.f32 %v538_v58, %v1232_v20 }
 0x25d   : > { %v550_v60 = vmul.f32 %v549_v53, %v1232_v20  ;;  %v575_v61 = vmul.f32 %v574_v54, %v1253_v43  ;;  %v586_v62 = vmul.f32 %v585_v55, %v1253_v43  ;;  %v614_v17 = vadd.f32 0.00028619796, %v613_v59 }
 0x25e   : > { %v511_v0 = vadd.f32 0.4994258, %v510_v57  ;;  %v500_v3 = vadd.f32 0.18741608, %v499_v56  ;;  %v625_v18 = vadd.f32 0.001143296, %v624_v63 }
 0x25f   : > { %v551_v1 = vadd.f32 0.4994258, %v550_v60  ;;  %v587_v2 = vadd.f32 0.014752088, %v586_v62  ;;  %v576_v6 = vadd.f32 0.0036580483, %v575_v61  ;;  %v615_v27 = vmul.f32 %v614_v17, %v1256_v47 }
 0x260   : > { %v512_v4 = vmul.f32 %v511_v0, %v492_v19  ;;  %v626_v22 = vmul.f32 %v625_v18, %v1256_v47  ;;  %v501_v23 = vmul.f32 %v500_v3, %v492_v19  ;;  %v540_v24 = vadd.f32 0.18741608, %v539_v5 }
 0x261   : > { %v552_v7 = vmul.f32 %v551_v1, %v1232_v20  ;;  %v588_v8 = vmul.f32 %v587_v2, %v1253_v43  ;;  %v577_v25 = vmul.f32 %v576_v6, %v1253_v43  ;;  %v616_v34 = vadd.f32 0.0036580483, %v615_v27 }
 0x262   : > { %v513_v9 = vadd.f32 1.0, %v512_v4  ;;  %v627_v30 = vadd.f32 0.014752088, %v626_v22  ;;  %v502_v31 = vadd.f32 1.1283791, %v501_v23  ;;  %v541_v14 = vmul.f32 %v540_v24, %v1232_v20 }
 0x263   : > { %v553_v11 = vadd.f32 1.0, %v552_v7  ;;  %v589_v21 = vadd.f32 0.112945676, %v588_v8  ;;  %v578_v33 = vadd.f32 0.05243302, %v577_v25  ;;  %v617_v20 = vmul.f32 %v616_v34, %v1256_v47 }
 0x264   : > { %914 = vrcp.f32 %v513_v9  ;;  %v628_v36 = vmul.f32 %v627_v30, %v1256_v47  ;;  %v503_v40 = vmul.f32 %v502_v31, %v1222_v13  ;;  %v542_v41 = vadd.f32 1.1283791, %v541_v14 }
 0x265   : > { %916 = vrcp.f32 %v553_v11  ;;  %v590_v29 = vmul.f32 %v589_v21, %v1253_v43  ;;  %v579_v46 = vmul.f32 %v578_v33, %v1253_v43  ;;  %v523_v49 = vand.u32 2147483647, %v513_v9 }
 0x266   : > { %v629_v44 = vadd.f32 0.112945676, %v628_v36  ;;  %v525_v50 = vand.u32 2147483648, %v513_v9  ;;  %v565_v54 = vand.u32 2147483648, %v553_v11  ;;  %v563_v55 = vand.u32 2147483647, %v553_v11 }
 0x267   : > { %v591_v16 = vadd.f32 0.4994258, %v590_v29  ;;  %vm519_vm12 = vweird.f32 %v513_v9  ;;  %v580_v58 = vadd.f32 0.18741608, %v579_v46  ;;  %v618_v59 = vadd.f32 0.05243302, %v617_v20 }
 0x268   : > { %v630_v52 = vmul.f32 %v629_v44, %v1256_v47  ;;  %v526_v60 = vor.u32 1.1754944e-38, %v525_v50  ;;  %vm559_vm14 = vweird.f32 %v553_v11  ;;  %vm524_vm15 = vcmp.eq.f32.partialorder %v523_v49, 8.507059e+37 }
 0x269   : > { %v592_v39 = vmul.f32 %v591_v16, %v1253_v43  ;;  %v543_v0 = vmul.f32 %v542_v41, %v1225_v15  ;;  %v566_v1 = vor.u32 1.1754944e-38, %v565_v54  ;;  %vm564_vm1 = vcmp.eq.f32.partialorder %v563_v55, 8.507059e+37 }
 0x26a   : > { %v915_v37 = vpop.eup %914  ;;  %v631_v56 = vadd.f32 0.4994258, %v630_v52  ;;  %v581_v8 = vmul.f32 %v580_v58, %v1253_v43  ;;  %v619_v17 = vmul.f32 %v618_v59, %v1256_v47  ;;  %v483_v15 = vmul.f32 0.5, %v1217_v10 }
 0x26b   : > { %v917_v19 = vpop.eup %916  ;;  %v515_v38 = vmul.f32 %v915_v37, %v513_v9  ;;  %v1278_v48 = vadd.f32 1.0, %v592_v39  ;;  %vm520_vm10 = vweird.f32 %v915_v37  ;;  %v484_v21 = vmul.f32 0.5, %v1219_v12 }
 0x26c   : > { %v555_v42 = vmul.f32 %v917_v19, %v553_v11  ;;  %vm560_vm11 = vweird.f32 %v917_v19  ;;  %vm521_vm13 = vmor %vm519_vm12, %vm520_vm10  ;;  %v632_v62 = vmul.f32 %v631_v56, %v1256_v47  ;;  %v582_v25 = vadd.f32 1.1283791, %v581_v8 }
 0x26d   : > { %v516_v45 = vsub.f32 1.0, %v515_v38  ;;  %918 = vrcp.f32 %v1278_v48  ;;  %vm561_vm0 = vmor %vm559_vm14, %vm560_vm11  ;;  %v605_v27 = vand.u32 2147483648, %v1278_v48  ;;  %v620_v43 = vadd.f32 0.18741608, %v619_v17 }
 0x26e   : > { %v556_v51 = vsub.f32 1.0, %v555_v42  ;;  %v633_v4 = vadd.f32 1.0, %v632_v62  ;;  %v603_v31 = vand.u32 2147483647, %v1278_v48  ;;  %vm599_vm3 = vweird.f32 %v1278_v48 }
 0x26f   : > { %v517_v53 = vmul.f32 %v915_v37, %v516_v45  ;;  %v606_v12 = vor.u32 1.1754944e-38, %v605_v27  ;;  %v621_v34 = vmul.f32 %v620_v43, %v1256_v47  ;;  %v583_v36 = vmul.f32 %v582_v25, %v1242_v32 }
 0x270   : > { %v557_v13 = vmul.f32 %v917_v19, %v556_v51  ;;  %920 = vrcp.f32 %v633_v4  ;;  %vm604_vm5 = vcmp.eq.f32.partialorder %v603_v31, 8.507059e+37  ;;  %v645_v42 = vand.u32 2147483648, %v633_v4 }
 0x271   : > { %v518_v57 = vadd.f32 %v915_v37, %v517_v53  ;;  %v622_v41 = vadd.f32 1.1283791, %v621_v34  ;;  %v643_v46 = vand.u32 2147483647, %v633_v4  ;;  %vm639_vm7 = vweird.f32 %v633_v4 }
 0x272   : > { %v558_v61 = vadd.f32 %v917_v19, %v557_v13  ;;  %v646_v32 = vor.u32 1.1754944e-38, %v645_v42  ;;  %v486_v13 = vmul.f32 0.5, %v1239_v28 }
 0x273   : > { %v522_v63 = vsel %vm521_vm13, %v915_v37, %v518_v57  ;;  %v919_v5 = vpop.eup %918  ;;  %v623_v49 = vmul.f32 %v622_v41, %v1246_v35  ;;  %vm644_vm9 = vcmp.eq.f32.partialorder %v643_v46, 8.507059e+37 }
 0x274   : > { %v527_v2 = vsel %vm524_vm15, %v526_v60, %v522_v63  ;;  %v562_v3 = vsel %vm561_vm0, %v917_v19, %v558_v61  ;;  %v595_v9 = vmul.f32 %v919_v5, %v1278_v48  ;;  %vm600_vm2 = vweird.f32 %v919_v5 }
 0x275   : > { %v528_v6 = vmul.f32 %v527_v2, %v503_v40  ;;  %v567_v7 = vsel %vm564_vm1, %v566_v1, %v562_v3  ;;  %vm601_vm4 = vmor %vm599_vm3, %vm600_vm2  ;;  %v485_v48 = vmul.f32 0.5, %v1236_v26 }
 0x276   : > { %v568_v18 = vmul.f32 %v567_v7, %v543_v0  ;;  %v596_v23 = vsub.f32 1.0, %v595_v9  ;;  %v921_v10 = vpop.eup %920 }
 0x277   : > { %v800_v11 = vclamps-f32 %v528_v6, 1.0  ;;  %v635_v19 = vmul.f32 %v921_v10, %v633_v4  ;;  %vm640_vm6 = vweird.f32 %v921_v10 }
 0x278   : > { %v801_v22 = vclamps-f32 %v568_v18, 1.0  ;;  %v597_v30 = vmul.f32 %v919_v5, %v596_v23  ;;  %vm641_vm8 = vmor %vm639_vm7, %vm640_vm6 }
 0x279   : > { %v651_v24 = vadd.f32 1.0, %v800_v11  ;;  %v636_v40 = vsub.f32 1.0, %v635_v19 }
 0x27a   : > { %v652_v29 = vadd.f32 1.0, %v801_v22  ;;  %v598_v16 = vadd.f32 %v919_v5, %v597_v30 }
 0x27b   : > { %v655_v14 = vmul.f32 %v651_v24, %v483_v15  ;;  %v637_v45 = vmul.f32 %v921_v10, %v636_v40 }
 0x27c   : > { %v656_v33 = vmul.f32 %v652_v29, %v484_v21  ;;  %v602_v37 = vsel %vm601_vm4, %v919_v5, %v598_v16 }
 0x27d   : > { %659 = vst [vmem:[%s1197_s5] sm:$0xff] %v655_v14  ;;  %v607_v38 = vsel %vm604_vm5, %v606_v12, %v602_v37  ;;  %v638_v20 = vadd.f32 %v921_v10, %v637_v45 }
 0x27e   : > { %660 = vst [vmem:[%s1197_s5 + $0x8] sm:$0xff] %v656_v33  ;;  %v608_v39 = vmul.f32 %v607_v38, %v583_v36 }
 0x27f   : > { %v642_v50 = vsel %vm641_vm8, %v921_v10, %v638_v20 }
 0x280   : > { %v802_v44 = vclamps-f32 %v608_v39, 1.0  ;;  %v647_v52 = vsel %vm644_vm9, %v646_v32, %v642_v50 }
 0x281   : > { %v648_v53 = vmul.f32 %v647_v52, %v623_v49 }
 0x282   : > { %v653_v47 = vadd.f32 1.0, %v802_v44 }
 0x283   : > { %v803_v54 = vclamps-f32 %v648_v53, 1.0 }
 0x284   : > { %v657_v51 = vmul.f32 %v653_v47, %v485_v48 }
 0x285   : > { %v654_v55 = vadd.f32 1.0, %v803_v54 }
 0x286   : > { %661 = vst [vmem:[%s1197_s5 + $0x10] sm:$0xff] %v657_v51 }
 0x287   : > { %v658_v56 = vmul.f32 %v654_v55, %v486_v13 }
 0x289   : > { %662 = vst [vmem:[%s1197_s5 + $0x18] sm:$0xff] %v658_v56 }
 0x28a PF: > { %s811_s18 = sshll.u32 %s1038_s19, 5  ;;  %s679_s7 = sshll.u32 %s1197_s5, 4  ;;  %s680_s7 = int_to_ptr.vmem [resolvable:$true] %s679_s7 }
 0x28b   : > { %s678_s30 = scalar_lea.hbm %s1352_s4, %s811_s18  ;;  %s664_s10 = scalar_lea.sflag [#allocation6], %s239_s14 }
 0x28c   : > { %s681_s8 = sshll.u32 %s678_s30, 4  ;;  %s972_s19 = scalar_lea.hbm %s1352_s4, 64  ;;  %s682_s8 = int_to_ptr.hbm [resolvable:$true] %s681_s8 }
 0x28d   : > { %s966_s11 = sshra.s32 %s682_s8, 4  ;;  %s967_s11 = int_to_ptr.hbm [resolvable:$true] %s966_s11 }
 0x28e   : > { %s968_s12 = scalar_lea.hbm %s967_s11, 32  ;;  %p973_p10 = scmp.lt.s32.totalorder %s967_s11, %s1352_s4 }
 0x28f   : > { %p969_p6 = scmp.ne.s32.totalorder %s967_s11, %s968_s12  ;;  %p974_p11 = scmp.lt.s32.totalorder %s972_s19, %s968_s12 }
 0x291   : > { %p970_p7 = pnand %p969_p6, %p1135_p3  ;;  %p975_p12 = por %p974_p11, %p973_p10 }
 0x293   : > { %p971_p8 = pneg %p970_p7 }
 0x295   : > { %p976_p13 = pnand %p975_p12, %p971_p8 }
 0x297   : > { %979 = shalt.err (!%p976_p13)
}
 0x298   : > { %s1058_s14 = smov 256   ;;  %s1059_s5 = smov 16  }
 0x299   : > { %822 = dma.vmem_to_hbm [thread:$0]  (%p1135_p3), %s680_s7, 512, %s682_s8, %s664_s10, %s1058_s14, %s1058_s14, %s1059_s5  }
 0x29a PF: > { %p834_p0 = scmp.ge.s32.totalorder %s1050_s22, 2  ;;  %s696_s18 = sand.u32 1, %s1022_s15  }
 0x29b   : > { %s697_s6 = scalar_lea.sflag [#allocation6], %s696_s18 }
 0x29c   : > { %p829_p1 = pnand %p834_p0, %p1145_p9 }
 0x29e   : > { %p830_p2 = pneg %p829_p1 }
 0x2a0   : > { %1017 = dma.done.wait (%p830_p2), %s697_s6, 512  }
 0x2a1   : > { %1019 = vsyncadd (%p830_p2), %s697_s6, 4294966784  ;;  %s18_s22 = sadd.s32 1, %s1050_s22   ;;  %s1356_s15 = smov %s1026_s16 }
 0x2a2   : > { %p15_p4 = scmp.ge.s32.totalorder %s18_s22, 6   ;;  %s1357_s16 = smov %s1030_s17 }
 0x2a3   : > { %s1358_s17 = smov %s1161_s9  ;;  %s1359_s18 = smov %s1042_s20 }
 0x2a4   : > { %s1360_s19 = smov %s1046_s21  ;;  %s1361_s20 = smov %s1364_s25 }
 0x2a5   : > { %s1362_s21 = smov %s1368_s26  ;;  %17 = sbr.rel (!%p15_p4) target bundleno = 6 (0x6), region = 88 }
 0x2aa   :  { %703 = vsyncpa [#allocation5], 1 }
 0x2ab   :  { %705 = vsyncpa [#allocation5 + $0x1], 1 }
 0x2ac   :  { %706 = vsyncpa [#allocation6], 1 }
 0x2ad   :  { %708 = vsyncpa [#allocation6 + $0x1], 1 }

</bundles_post_ra>
